<compile_context>
chip_gen: v5e
topology: v5e:2x2
jax: 0.10.0
libtpu: 0.0.40
codegen_flags: <defaults>
</compile_context>

<pallas_src>
import functools

import jax
import jax.numpy as jnp
import numpy as np
from jax.experimental import pallas as pl
from jax.experimental.pallas import tpu as pltpu


def _round_up(x, m):
    return ((x + m - 1) // m) * m


def gcn_kernel(x_ref, w_ref, adj_ref, b_ref, o_ref, acc_ref):
    """One (row-tile i, k-tile) step of  out = adj @ (x @ w) + bias.

    x_ref:   (tk, fin)       compute_dtype  -- node-feature rows of k-tile
    w_ref:   (fin, fout_p)   compute_dtype  -- full weight, fout padded to 128
    adj_ref: (tm, tk)        compute_dtype  -- adjacency tile (i, k)
    b_ref:   (1, fout_p)     f32            -- bias (zero-padded)
    o_ref:   (tm, fout_p)    f32            -- output row tile i
    acc_ref: (tm, fout_p)    f32 scratch    -- accumulator, lives across k
    """
    k = pl.program_id(1)

    @pl.when(k == 0)
    def _():
        acc_ref[...] = jnp.zeros_like(acc_ref)

    # support block = X_k @ W  (tiny: tk x fin x fout_p), f32 accumulation on MXU.
    support = jnp.dot(x_ref[...], w_ref[...], preferred_element_type=jnp.float32)
    # out tile += A[i, k] @ support_k ; feed narrow dtype to MXU, accumulate f32.
    acc_ref[...] += jnp.dot(
        adj_ref[...], support.astype(adj_ref.dtype),
        preferred_element_type=jnp.float32)

    @pl.when(k == pl.num_programs(1) - 1)
    def _():
        # Bias add rides in the store epilogue, off the per-k critical path.
        o_ref[...] = (acc_ref[...] + b_ref[...]).astype(o_ref.dtype)


def _pad2(a, rows, cols, dtype):
    """Cast to `dtype` and zero-pad to (rows, cols); no-ops avoided."""
    a = a.astype(dtype)
    pr, pc = rows - a.shape[0], cols - a.shape[1]
    if pr or pc:
        a = jnp.pad(a, ((0, pr), (0, pc)))
    return a


@functools.partial(jax.jit, static_argnames=("tm", "tk", "compute_dtype"))
def graph_convolution(x, weight, adj, bias=None, *, tm=256, tk=512,
                      compute_dtype=jnp.bfloat16):
    """Pallas GCN forward. x:[N,Fin], weight:[Fin,Fout], adj:[N,N], bias:[Fout]|None."""
    N, fin = x.shape
    fout = weight.shape[1]
    assert weight.shape[0] == fin and adj.shape == (N, N)

    # Lane-dense output: pad out_features up to a multiple of 128.
    fout_p = _round_up(fout, 128)

    # Tile sizes: row tile multiple of 8, k tile multiple of 128, capped by N.
    tm = min(tm, _round_up(N, 8))
    tk = min(tk, _round_up(N, 128))
    n_rows = _round_up(N, tm)   # padded output-row extent
    n_k = _round_up(N, tk)      # padded contraction extent (adj cols / x rows)

    # One-time wrapper-side conversions: cast to the (narrow) compute dtype and
    # zero-pad to tile boundaries.  Zero adj columns / x rows contribute nothing.
    x_p = _pad2(x, n_k, fin, compute_dtype)
    w_p = _pad2(weight, fin, fout_p, compute_dtype)
    adj_p = _pad2(adj, n_rows, n_k, compute_dtype)
    if bias is None:
        # TODO(synk): bias=None path handled with a zero bias (same semantics).
        b_p = jnp.zeros((1, fout_p), jnp.float32)
    else:
        b_p = _pad2(bias.reshape(1, fout), 1, fout_p, jnp.float32)

    grid = (n_rows // tm, n_k // tk)

    # TODO(synk): for genuinely sparse adj at scale, skip all-zero adj tiles via
    # PrefetchScalarGridSpec scalar-prefetched block lists; dense tiles here.
    out_p = pl.pallas_call(
        gcn_kernel,
        out_shape=jax.ShapeDtypeStruct((n_rows, fout_p), jnp.float32),
        grid_spec=pltpu.PrefetchScalarGridSpec(
            num_scalar_prefetch=0,
            grid=grid,
            in_specs=[
                pl.BlockSpec((tk, fin), lambda i, k: (k, 0)),       # x rows of k-tile
                pl.BlockSpec((fin, fout_p), lambda i, k: (0, 0)),   # full weight
                pl.BlockSpec((tm, tk), lambda i, k: (i, k)),        # adjacency tile
                pl.BlockSpec((1, fout_p), lambda i, k: (0, 0)),     # bias
            ],
            out_specs=pl.BlockSpec((tm, fout_p), lambda i, k: (i, 0)),
            scratch_shapes=[pltpu.VMEM((tm, fout_p), jnp.float32)],
        ),
        compiler_params=pltpu.CompilerParams(
            # row tiles parallel (2 TCs on v7x), k reduction arbitrary and last
            dimension_semantics=("parallel", "arbitrary"),
            vmem_limit_bytes=64 * 1024 * 1024,
        ),
    )(x_p, w_p, adj_p, b_p)

    return out_p[:N, :fout]


def reference(x, weight, adj, bias):
    return adj @ (x @ weight) + bias[None, :]


if __name__ == "__main__":
    # Small shapes consistent with the module: N nodes, in/out feature dims.
    N, in_features, out_features = 128, 64, 32

    key = jax.random.PRNGKey(0)
    kx, kw, kb, ka = jax.random.split(key, 4)

    # Deterministic parameter init mirroring reset_parameters():
    # uniform(-stdv, stdv) with stdv = 1/sqrt(out_features)
    stdv = 1.0 / np.sqrt(out_features)
    weight = jax.random.uniform(kw, (in_features, out_features),
                                minval=-stdv, maxval=stdv, dtype=jnp.float32)
    bias = jax.random.uniform(kb, (out_features,),
                              minval=-stdv, maxval=stdv, dtype=jnp.float32)

    # Node features.
    x = jax.random.normal(kx, (N, in_features), dtype=jnp.float32)

    # Deterministic "normalized adjacency": sparse-ish random graph + self loops,
    # row-normalized (dense representation of the spmm operand).
    raw = jax.random.uniform(ka, (N, N), dtype=jnp.float32)
    adj = jnp.where(raw > 0.9, 1.0, 0.0) + jnp.eye(N, dtype=jnp.float32)
    adj = adj / jnp.sum(adj, axis=1, keepdims=True)

    ref = reference(x, weight, adj, bias)

    # Exact (f32-compute) path: must match the reference tightly.
    out_f32 = graph_convolution(x, weight, adj, bias, compute_dtype=jnp.float32)
    out_f32 = jax.block_until_ready(out_f32)
    np.testing.assert_allclose(np.asarray(out_f32), np.asarray(ref),
                               rtol=1e-5, atol=1e-5)

    # Fast (bf16 MXU operands, f32 accumulation) path: relaxed tolerance.
    out_bf16 = graph_convolution(x, weight, adj, bias)   # compute_dtype=bf16
    out_bf16 = jax.block_until_ready(out_bf16)
    np.testing.assert_allclose(np.asarray(out_bf16), np.asarray(ref),
                               rtol=3e-2, atol=3e-2)

    print("KERNEL_OK")
</pallas_src>

<mosaic_0001>
module attributes {stable_mosaic.version = 11 : i64} {
  func.func @gcn_kernel(%arg0: i32, %arg1: i32, %arg2: memref<128x64xf32, #tpu.memory_space<vmem>>, %arg3: memref<64x128xf32, #tpu.memory_space<vmem>>, %arg4: memref<128x128xf32, #tpu.memory_space<vmem>>, %arg5: memref<1x128xf32, #tpu.memory_space<vmem>>, %arg6: memref<128x128xf32, #tpu.memory_space<vmem>>, %arg7: memref<128x128xf32, #tpu.memory_space<vmem>>) attributes {dimension_semantics = [#tpu.dimension_semantics<parallel>, #tpu.dimension_semantics<arbitrary>], iteration_bounds = array<i64: 1, 1>, scalar_prefetch = 0 : i64, scratch_operands = 1 : i64, tpu.core_type = #tpu.core_type<tc>, window_params = [{transform_indices = @transform_0, window_bounds = array<i64: 128, 64>}, {pipeline_mode = #tpu.pipeline_mode<synchronous>, transform_indices = @transform_1, window_bounds = array<i64: 64, 128>}, {transform_indices = @transform_2, window_bounds = array<i64: 128, 128>}, {pipeline_mode = #tpu.pipeline_mode<synchronous>, transform_indices = @transform_3, window_bounds = array<i64: 1, 128>}, {transform_indices = @transform_4, window_bounds = array<i64: 128, 128>}]} {
    %c0_i32 = arith.constant 0 : i32
    %0 = arith.cmpi eq, %arg1, %c0_i32 : i32
    %1 = arith.extui %0 : i1 to i32
    %c0_i32_0 = arith.constant 0 : i32
    %2 = arith.cmpi ne, %1, %c0_i32_0 : i32
    scf.if %2 {
      %cst_13 = arith.constant 0.000000e+00 : f32
      %14 = vector.broadcast %cst_13 : f32 to vector<128x128xf32>
      %c0_14 = arith.constant 0 : index
      %c0_15 = arith.constant 0 : index
      %15 = vector.load %arg7[%c0_14, %c0_15] : memref<128x128xf32, #tpu.memory_space<vmem>>, vector<128x128xf32>
      tpu.vector_store %arg7[%c0_14, %c0_15], %14 {strides = array<i32>} : memref<128x128xf32, #tpu.memory_space<vmem>>, vector<128x128xf32>,
    } else {
    }
    %c0 = arith.constant 0 : index
    %c0_1 = arith.constant 0 : index
    %3 = vector.load %arg2[%c0, %c0_1] : memref<128x64xf32, #tpu.memory_space<vmem>>, vector<128x64xf32>
    %c0_2 = arith.constant 0 : index
    %c0_3 = arith.constant 0 : index
    %4 = vector.load %arg3[%c0_2, %c0_3] : memref<64x128xf32, #tpu.memory_space<vmem>>, vector<64x128xf32>
    %cst = arith.constant dense<0.000000e+00> : vector<128x128xf32>
    %5 = tpu.matmul %3, %4, %cst {dimension_numbers = #tpu.dot_dimension_numbers<[1], [0], [0], [1], [0, 0, 1, 1], [], []>} : vector<128x64xf32>, vector<64x128xf32>, vector<128x128xf32> -> vector<128x128xf32>
    %c0_4 = arith.constant 0 : index
    %c0_5 = arith.constant 0 : index
    %6 = vector.load %arg7[%c0_4, %c0_5] : memref<128x128xf32, #tpu.memory_space<vmem>>, vector<128x128xf32>
    %c0_6 = arith.constant 0 : index
    %c0_7 = arith.constant 0 : index
    %7 = vector.load %arg4[%c0_6, %c0_7] : memref<128x128xf32, #tpu.memory_space<vmem>>, vector<128x128xf32>
    %cst_8 = arith.constant dense<0.000000e+00> : vector<128x128xf32>
    %8 = tpu.matmul %7, %5, %cst_8 {dimension_numbers = #tpu.dot_dimension_numbers<[1], [0], [0], [1], [0, 0, 1, 1], [], []>} : vector<128x128xf32>, vector<128x128xf32>, vector<128x128xf32> -> vector<128x128xf32>
    %9 = arith.addf %6, %8 : vector<128x128xf32>
    %c0_9 = arith.constant 0 : index
    %c0_10 = arith.constant 0 : index
    %10 = vector.load %arg7[%c0_9, %c0_10] : memref<128x128xf32, #tpu.memory_space<vmem>>, vector<128x128xf32>
    tpu.vector_store %arg7[%c0_9, %c0_10], %9 {strides = array<i32>} : memref<128x128xf32, #tpu.memory_space<vmem>>, vector<128x128xf32>,
    %c0_i32_11 = arith.constant 0 : i32
    %11 = arith.cmpi eq, %arg1, %c0_i32_11 : i32
    %12 = arith.extui %11 : i1 to i32
    %c0_i32_12 = arith.constant 0 : i32
    %13 = arith.cmpi ne, %12, %c0_i32_12 : i32
    scf.if %13 {
      %c0_13 = arith.constant 0 : index
      %c0_14 = arith.constant 0 : index
      %14 = vector.load %arg7[%c0_13, %c0_14] : memref<128x128xf32, #tpu.memory_space<vmem>>, vector<128x128xf32>
      %c0_15 = arith.constant 0 : index
      %c0_16 = arith.constant 0 : index
      %15 = vector.load %arg5[%c0_15, %c0_16] : memref<1x128xf32, #tpu.memory_space<vmem>>, vector<1x128xf32>
      %16 = vector.broadcast %15 : vector<1x128xf32> to vector<128x128xf32>
      %17 = arith.addf %14, %16 : vector<128x128xf32>
      %c0_17 = arith.constant 0 : index
      %c0_18 = arith.constant 0 : index
      %18 = vector.load %arg6[%c0_17, %c0_18] : memref<128x128xf32, #tpu.memory_space<vmem>>, vector<128x128xf32>
      tpu.vector_store %arg6[%c0_17, %c0_18], %17 {strides = array<i32>} : memref<128x128xf32, #tpu.memory_space<vmem>>, vector<128x128xf32>,
    } else {
    }
    return
  }
  func.func @transform_0(%arg0: i32, %arg1: i32) -> (i32, i32) {
    %c0_i32 = arith.constant 0 : i32
    %c0_i32_0 = arith.constant 0 : i32
    return %arg1, %c0_i32 : i32, i32
  }
  func.func @transform_1(%arg0: i32, %arg1: i32) -> (i32, i32) {
    %c0_i32 = arith.constant 0 : i32
    %c0_i32_0 = arith.constant 0 : i32
    %c0_i32_1 = arith.constant 0 : i32
    return %c0_i32, %c0_i32_0 : i32, i32
  }
  func.func @transform_2(%arg0: i32, %arg1: i32) -> (i32, i32) {
    %c0_i32 = arith.constant 0 : i32
    return %arg0, %arg1 : i32, i32
  }
  func.func @transform_3(%arg0: i32, %arg1: i32) -> (i32, i32) {
    %c0_i32 = arith.constant 0 : i32
    %c0_i32_0 = arith.constant 0 : i32
    %c0_i32_1 = arith.constant 0 : i32
    return %c0_i32, %c0_i32_0 : i32, i32
  }
  func.func @transform_4(%arg0: i32, %arg1: i32) -> (i32, i32) {
    %c0_i32 = arith.constant 0 : i32
    %c0_i32_0 = arith.constant 0 : i32
    return %arg0, %c0_i32 : i32, i32
  }
}

</mosaic_0001>

<bundles_post_ra>
// kernel: graph_convolution.1
= control target key start
LH: loop header
LB: loop body
LE: loop exit
PB: predicated region body
PF: predicated region fallthrough
CT: control target
= control target key end

     0   :  { %vm61_vm0 = vcmask 523264   ;;  %s637_s1 = inlined_call_operand.vmem [shape: f32[64,128], index: 1, kind: input, shape index: {}]   ;;  %s638_s0 = inlined_call_operand.vmem [shape: f32[128,64], index: 0, kind: input, shape index: {}]   ;;  %s639_s3 = inlined_call_operand.vmem [shape: f32[1,128], index: 3, kind: input, shape index: {}]   ;;  %s640_s2 = inlined_call_operand.vmem [shape: f32[128,128], index: 2, kind: input, shape index: {}]   ;;  %s641_s4 = inlined_call_operand.vmem [shape: f32[128,128], index: 4, kind: output, shape index: {}]  }
   0x1   :  { %v60_v0 = vld [vmem:[%s637_s1 + $0x38] sm:$0xff]  ;;  %v59_v1 = vld [vmem:[%s637_s1 + $0x30] sm:$0xff]  ;;  %v58_v2 = vld [vmem:[%s637_s1 + $0x28] sm:$0xff] }
   0x2   :  { %379 = vmatpush.msra.mxu3 %v60_v0  ;;  %118 = vmatpush.msra.mxu0 %v60_v0  ;;  %v57_v3 = vld [vmem:[%s637_s1 + $0x20] sm:$0xff]  ;;  %v56_v4 = vld [vmem:[%s637_s1 + $0x18] sm:$0xff]  ;;  %v55_v5 = vld [vmem:[%s637_s1 + $0x10] sm:$0xff] }
   0x3   :  { %v54_v6 = vld [vmem:[%s637_s1 + $0x8] sm:$0xff]  ;;  %v53_v7 = vld [vmem:[%s637_s1] sm:$0xff]  ;;  %v47_v10 = vld [vmem:[%s638_s0 + $0x50] sm:$0xff] }
   0x4   :  { %380 = vmatpush.msra.mxu3 %v59_v1  ;;  %119 = vmatpush.msra.mxu0 %v59_v1  ;;  %v46_v8 = vld [vmem:[%s638_s0 + $0x48] sm:$0xff]  ;;  %v37_v9 = vld [vmem:[%s638_s0] sm:$0xff]  ;;  %v48_v12 = vld [vmem:[%s638_s0 + $0x58] sm:$0xff] }
   0x5   :  { %v38_v11 = vld [vmem:[%s638_s0 + $0x8] sm:$0xff]  ;;  %v39_v13 = vld [vmem:[%s638_s0 + $0x10] sm:$0xff]  ;;  %v49_v14 = vld [vmem:[%s638_s0 + $0x60] sm:$0xff] }
   0x6   :  { %381 = vmatpush.msra.mxu3 %v58_v2  ;;  %120 = vmatpush.msra.mxu0 %v58_v2  ;;  %v40_v15 = vld [vmem:[%s638_s0 + $0x18] sm:$0xff]  ;;  %v50_v16 = vld [vmem:[%s638_s0 + $0x68] sm:$0xff]  ;;  %v41_v17 = vld [vmem:[%s638_s0 + $0x20] sm:$0xff] }
   0x7   :  { %v51_v18 = vld [vmem:[%s638_s0 + $0x70] sm:$0xff]  ;;  %v42_v19 = vld [vmem:[%s638_s0 + $0x28] sm:$0xff]  ;;  %v52_v20 = vld [vmem:[%s638_s0 + $0x78] sm:$0xff] }
   0x8   :  { %382 = vmatpush.msra.mxu3 %v57_v3  ;;  %121 = vmatpush.msra.mxu0 %v57_v3  ;;  %v43_v21 = vld [vmem:[%s638_s0 + $0x30] sm:$0xff]  ;;  %v44_v22 = vld [vmem:[%s638_s0 + $0x38] sm:$0xff]  ;;  %v45_v23 = vld [vmem:[%s638_s0 + $0x40] sm:$0xff] }
   0x9   :  { %v198_v40 = vld [vmem:[%s640_s2 + $0x38] sm:$0xff]  ;;  %v191_v41 = vld [vmem:[%s640_s2] sm:$0xff]  ;;  %v192_v43 = vld [vmem:[%s640_s2 + $0x8] sm:$0xff] }
   0xa   :  { %383 = vmatpush.msra.mxu3 %v56_v4  ;;  %122 = vmatpush.msra.mxu0 %v56_v4  ;;  %v199_v42 = vld [vmem:[%s640_s2 + $0x40] sm:$0xff]  ;;  %v205_v44 = vld [vmem:[%s640_s2 + $0x70] sm:$0xff]  ;;  %v200_v45 = vld [vmem:[%s640_s2 + $0x48] sm:$0xff] }
   0xb   :  { %v193_v46 = vld [vmem:[%s640_s2 + $0x10] sm:$0xff]  ;;  %v206_v47 = vld [vmem:[%s640_s2 + $0x78] sm:$0xff]  ;;  %v195_v51 = vld [vmem:[%s640_s2 + $0x20] sm:$0xff] }
   0xc   :  { %384 = vmatpush.msra.mxu3 %v55_v5  ;;  %123 = vmatpush.msra.mxu0 %v55_v5  ;;  %v201_v48 = vld [vmem:[%s640_s2 + $0x50] sm:$0xff]  ;;  %v194_v49 = vld [vmem:[%s640_s2 + $0x18] sm:$0xff]  ;;  %v203_v52 = vld [vmem:[%s640_s2 + $0x60] sm:$0xff] }
   0xd   :  { %v202_v50 = vld [vmem:[%s640_s2 + $0x58] sm:$0xff]  ;;  %v196_v53 = vld [vmem:[%s640_s2 + $0x28] sm:$0xff]  ;;  %v197_v55 = vld [vmem:[%s640_s2 + $0x30] sm:$0xff] }
   0xe   :  { %385 = vmatpush.msra.mxu3 %v54_v6  ;;  %124 = vmatpush.msra.mxu0 %v54_v6  ;;  %v204_v54 = vld [vmem:[%s640_s2 + $0x68] sm:$0xff]  ;;  %v419_v56 = vld [vmem:[%s639_s3] ss:$0 sm:$0xff] }
  0x10   :  { %386 = vmatpush.msra.mxu3 %v53_v7  ;;  %125 = vmatpush.msra.mxu0 %v53_v7 }
  0x11   :  { %372 = vmatmul.msk.f32.vlgmr.msra.gmra.mxu3 %vm61_vm0, %v46_v8  ;;  %363 = vmatmul.msk.f32.vlgmr.msra.gmra.mxu0 %vm61_vm0, %v37_v9 }
  0x19   :  { %373 = vmatmul.msk.f32.gmra.mxu3 %vm61_vm0, %v47_v10  ;;  %364 = vmatmul.msk.f32.gmra.mxu0 %vm61_vm0, %v38_v11 }
  0x21   :  { %374 = vmatmul.msk.f32.gmra.mxu3 %vm61_vm0, %v48_v12  ;;  %365 = vmatmul.msk.f32.gmra.mxu0 %vm61_vm0, %v39_v13 }
  0x29   :  { %375 = vmatmul.msk.f32.gmra.mxu3 %vm61_vm0, %v49_v14  ;;  %366 = vmatmul.msk.f32.gmra.mxu0 %vm61_vm0, %v40_v15 }
  0x31   :  { %376 = vmatmul.msk.f32.gmra.mxu3 %vm61_vm0, %v50_v16  ;;  %367 = vmatmul.msk.f32.gmra.mxu0 %vm61_vm0, %v41_v17 }
  0x39   :  { %377 = vmatmul.msk.f32.gmra.mxu3 %vm61_vm0, %v51_v18  ;;  %368 = vmatmul.msk.f32.gmra.mxu0 %vm61_vm0, %v42_v19 }
  0x41   :  { %378 = vmatmul.msk.f32.gmra.mxu3 %vm61_vm0, %v52_v20  ;;  %369 = vmatmul.msk.f32.gmra.mxu0 %vm61_vm0, %v43_v21 }
  0x49   :  { %370 = vmatmul.msk.f32.gmra.mxu0 %vm61_vm0, %v44_v22 }
  0x51   :  { %371 = vmatmul.msk.f32.gmra.mxu0 %vm61_vm0, %v45_v23 }
  0x8e   :  { %v533_v24 = vpop.f32.mrf.mxu0 }
  0x94   :  { %v154_v25 = vpop.f32.mrf.mxu3 }
  0x96   :  { %v130_v26 = vpop.f32.mrf.mxu0 }
  0x9c   :  { %v157_v27 = vpop.f32.mrf.mxu3 }
  0x9e   :  { %v133_v28 = vpop.f32.mrf.mxu0 }
  0xa4   :  { %v160_v29 = vpop.f32.mrf.mxu3 }
  0xa6   :  { %v136_v30 = vpop.f32.mrf.mxu0 }
  0xac   :  { %v163_v31 = vpop.f32.mrf.mxu3 }
  0xae   :  { %v139_v32 = vpop.f32.mrf.mxu0 }
  0xb4   :  { %v166_v33 = vpop.f32.mrf.mxu3 }
  0xb6   :  { %v142_v34 = vpop.f32.mrf.mxu0 }
  0xbc   :  { %v169_v35 = vpop.f32.mrf.mxu3 }
  0xbe   :  { %v145_v36 = vpop.f32.mrf.mxu0 }
  0xc4   :  { %v172_v37 = vpop.f32.mrf.mxu3 }
  0xc5   :  { %207 = vmatpush.msra.mxu1 %v172_v37  ;;  %387 = vmatpush.msra.mxu2 %v172_v37 }
  0xc6   :  { %388 = vmatpush.msrb.mxu3 %v172_v37  ;;  %v148_v38 = vpop.f32.mrf.mxu0 }
  0xc7   :  { %208 = vmatpush.msra.mxu1 %v169_v35  ;;  %389 = vmatpush.msra.mxu2 %v169_v35 }
  0xc8   :  { %390 = vmatpush.msrb.mxu3 %v169_v35 }
  0xc9   :  { %209 = vmatpush.msra.mxu1 %v166_v33  ;;  %391 = vmatpush.msra.mxu2 %v166_v33 }
  0xca   :  { %392 = vmatpush.msrb.mxu3 %v166_v33 }
  0xcb   :  { %210 = vmatpush.msra.mxu1 %v163_v31  ;;  %393 = vmatpush.msra.mxu2 %v163_v31 }
  0xcc   :  { %394 = vmatpush.msrb.mxu3 %v163_v31 }
  0xcd   :  { %211 = vmatpush.msra.mxu1 %v160_v29  ;;  %395 = vmatpush.msra.mxu2 %v160_v29 }
  0xce   :  { %396 = vmatpush.msrb.mxu3 %v160_v29  ;;  %v151_v39 = vpop.f32.mrf.mxu0 }
  0xcf   :  { %212 = vmatpush.msra.mxu1 %v157_v27  ;;  %397 = vmatpush.msra.mxu2 %v157_v27 }
  0xd0   :  { %398 = vmatpush.msrb.mxu3 %v157_v27 }
  0xd1   :  { %213 = vmatpush.msra.mxu1 %v154_v25  ;;  %399 = vmatpush.msra.mxu2 %v154_v25 }
  0xd2   :  { %400 = vmatpush.msrb.mxu3 %v154_v25 }
  0xd3   :  { %214 = vmatpush.msra.mxu1 %v151_v39  ;;  %401 = vmatpush.msra.mxu2 %v151_v39 }
  0xd4   :  { %402 = vmatpush.msrb.mxu3 %v151_v39 }
  0xd5   :  { %215 = vmatpush.msra.mxu1 %v148_v38  ;;  %403 = vmatpush.msra.mxu2 %v148_v38 }
  0xd6   :  { %404 = vmatpush.msrb.mxu3 %v148_v38 }
  0xd7   :  { %216 = vmatpush.msra.mxu1 %v145_v36  ;;  %405 = vmatpush.msra.mxu2 %v145_v36 }
  0xd8   :  { %406 = vmatpush.msrb.mxu3 %v145_v36 }
  0xd9   :  { %217 = vmatpush.msra.mxu1 %v142_v34  ;;  %407 = vmatpush.msra.mxu2 %v142_v34 }
  0xda   :  { %408 = vmatpush.msrb.mxu3 %v142_v34 }
  0xdb   :  { %218 = vmatpush.msra.mxu1 %v139_v32  ;;  %409 = vmatpush.msra.mxu2 %v139_v32 }
  0xdc   :  { %410 = vmatpush.msrb.mxu3 %v139_v32 }
  0xdd   :  { %219 = vmatpush.msra.mxu1 %v136_v30  ;;  %411 = vmatpush.msra.mxu2 %v136_v30 }
  0xde   :  { %412 = vmatpush.msrb.mxu3 %v136_v30 }
  0xdf   :  { %220 = vmatpush.msra.mxu1 %v133_v28  ;;  %413 = vmatpush.msra.mxu2 %v133_v28 }
  0xe0   :  { %414 = vmatpush.msrb.mxu3 %v133_v28 }
  0xe1   :  { %221 = vmatpush.msra.mxu1 %v130_v26  ;;  %415 = vmatpush.msra.mxu2 %v130_v26 }
  0xe2   :  { %416 = vmatpush.msrb.mxu3 %v130_v26 }
  0xe3   :  { %222 = vmatpush.msra.mxu1 %v533_v24  ;;  %417 = vmatpush.msra.mxu2 %v533_v24 }
  0xe4   :  { %418 = vmatpush.msrb.mxu3 %v533_v24  ;;  %244 = vmatmul.f32.vlgmr.msra.gmra.mxu2 %v198_v40 }
  0xe5   :  { %223 = vmatmul.f32.vlgmr.msra.gmra.mxu1 %v191_v41  ;;  %265 = vmatmul.f32.vlgmr.msrb.gmra.mxu3 %v205_v44 }
  0xec   :  { %247 = vmatmul.f32.gmra.mxu2 %v199_v42 }
  0xed   :  { %226 = vmatmul.f32.gmra.mxu1 %v192_v43  ;;  %268 = vmatmul.f32.gmra.mxu3 %v206_v47 }
  0xf4   :  { %250 = vmatmul.f32.gmra.mxu2 %v200_v45 }
  0xf5   :  { %229 = vmatmul.f32.gmra.mxu1 %v193_v46 }
  0xfc   :  { %253 = vmatmul.f32.gmra.mxu2 %v201_v48 }
  0xfd   :  { %232 = vmatmul.f32.gmra.mxu1 %v194_v49 }
 0x104   :  { %256 = vmatmul.f32.gmra.mxu2 %v202_v50 }
 0x105   :  { %235 = vmatmul.f32.gmra.mxu1 %v195_v51 }
 0x10c   :  { %259 = vmatmul.f32.gmra.mxu2 %v203_v52 }
 0x10d   :  { %238 = vmatmul.f32.gmra.mxu1 %v196_v53 }
 0x114   :  { %262 = vmatmul.f32.gmra.mxu2 %v204_v54 }
 0x115   :  { %241 = vmatmul.f32.gmra.mxu1 %v197_v55 }
 0x162   :  { %v224_v57 = vpop.f32.mrf.mxu1 }
 0x163   :  { %v327_v58 = vadd.f32 %v419_v56, %v224_v57 }
 0x165   :  { %343 = vst [vmem:[%s641_s4] sm:$0xff] %v327_v58 }
 0x167   :  { %v245_v59 = vpop.f32.mrf.mxu2 }
 0x168   :  { %v334_v60 = vadd.f32 %v419_v56, %v245_v59  ;;  %v266_v1 = vpop.f32.mrf.mxu3 }
 0x169   :  { %v341_v2 = vadd.f32 %v419_v56, %v266_v1 }
 0x16a   :  { %350 = vst [vmem:[%s641_s4 + $0x38] sm:$0xff] %v334_v60  ;;  %v227_v61 = vpop.f32.mrf.mxu1 }
 0x16b   :  { %v328_v62 = vadd.f32 %v419_v56, %v227_v61  ;;  %357 = vst [vmem:[%s641_s4 + $0x70] sm:$0xff] %v341_v2 }
 0x16d   :  { %344 = vst [vmem:[%s641_s4 + $0x8] sm:$0xff] %v328_v62 }
 0x16f   :  { %v248_v63 = vpop.f32.mrf.mxu2 }
 0x170   :  { %v335_v0 = vadd.f32 %v419_v56, %v248_v63  ;;  %v269_v7 = vpop.f32.mrf.mxu3 }
 0x171   :  { %v342_v8 = vadd.f32 %v419_v56, %v269_v7 }
 0x172   :  { %351 = vst [vmem:[%s641_s4 + $0x40] sm:$0xff] %v335_v0  ;;  %v230_v3 = vpop.f32.mrf.mxu1 }
 0x173   :  { %v329_v4 = vadd.f32 %v419_v56, %v230_v3  ;;  %358 = vst [vmem:[%s641_s4 + $0x78] sm:$0xff] %v342_v8 }
 0x175   :  { %345 = vst [vmem:[%s641_s4 + $0x10] sm:$0xff] %v329_v4 }
 0x177   :  { %v251_v5 = vpop.f32.mrf.mxu2 }
 0x178   :  { %v336_v6 = vadd.f32 %v419_v56, %v251_v5 }
 0x17a   :  { %352 = vst [vmem:[%s641_s4 + $0x48] sm:$0xff] %v336_v6  ;;  %v233_v9 = vpop.f32.mrf.mxu1 }
 0x17b   :  { %v330_v10 = vadd.f32 %v419_v56, %v233_v9 }
 0x17d   :  { %346 = vst [vmem:[%s641_s4 + $0x18] sm:$0xff] %v330_v10 }
 0x17f   :  { %v254_v11 = vpop.f32.mrf.mxu2 }
 0x180   :  { %v337_v12 = vadd.f32 %v419_v56, %v254_v11 }
 0x182   :  { %353 = vst [vmem:[%s641_s4 + $0x50] sm:$0xff] %v337_v12  ;;  %v236_v13 = vpop.f32.mrf.mxu1 }
 0x183   :  { %v331_v14 = vadd.f32 %v419_v56, %v236_v13 }
 0x185   :  { %347 = vst [vmem:[%s641_s4 + $0x20] sm:$0xff] %v331_v14 }
 0x187   :  { %v257_v15 = vpop.f32.mrf.mxu2 }
 0x188   :  { %v338_v16 = vadd.f32 %v419_v56, %v257_v15 }
 0x18a   :  { %354 = vst [vmem:[%s641_s4 + $0x58] sm:$0xff] %v338_v16  ;;  %v239_v17 = vpop.f32.mrf.mxu1 }
 0x18b   :  { %v332_v18 = vadd.f32 %v419_v56, %v239_v17 }
 0x18d   :  { %348 = vst [vmem:[%s641_s4 + $0x28] sm:$0xff] %v332_v18 }
 0x18f   :  { %v260_v19 = vpop.f32.mrf.mxu2 }
 0x190   :  { %v339_v20 = vadd.f32 %v419_v56, %v260_v19 }
 0x192   :  { %355 = vst [vmem:[%s641_s4 + $0x60] sm:$0xff] %v339_v20  ;;  %v242_v21 = vpop.f32.mrf.mxu1 }
 0x193   :  { %v333_v22 = vadd.f32 %v419_v56, %v242_v21 }
 0x195   :  { %349 = vst [vmem:[%s641_s4 + $0x30] sm:$0xff] %v333_v22 }
 0x197   :  { %v263_v23 = vpop.f32.mrf.mxu2 }
 0x198   :  { %v340_v24 = vadd.f32 %v419_v56, %v263_v23 }
 0x19a   :  { %356 = vst [vmem:[%s641_s4 + $0x68] sm:$0xff] %v340_v24 }

</bundles_post_ra>
